<compile_context>
chip_gen: v7x
topology: tpu7x:2x2x1
jax: 0.10.0
libtpu: 0.0.40
codegen_flags: <defaults>
</compile_context>

<pallas_src>
import jax
import jax.numpy as jnp
from jax.experimental import pallas as pl
from jax.experimental.pallas import tpu as pltpu


LANES = 128
SUBLANES = 8
ACC_ROWS = 32          # per-split accumulator block rows (4 independent vreg chains)
ROW_ALIGN = 32         # row-tile alignment: covers f32(8)/bf16(16)/int8(32) packing


def _round_up(x, m):
    return ((x + m - 1) // m) * m


def _chip_defaults():
    """Per-generation tile / split / VMEM choices (conservative fallback)."""
    try:
        kind = jax.devices()[0].device_kind.lower()
    except Exception:
        kind = ""
    if "v7" in kind or "7x" in kind:
        # 2 TCs, 3.2 TB/s each: big tiles + split across cores.
        # 3 inputs x 2 buffers x (8192,128) f32 = 24 MiB < 28 MiB limit.
        return {"num_splits": 2, "max_row_tile": 8192, "vmem_limit_bytes": 28 << 20}
    if "v6" in kind or "6e" in kind:
        # Single TC; 4096-row f32 tiles (12 MiB double-buffered) fit the 32 MiB default.
        return {"num_splits": 1, "max_row_tile": 4096, "vmem_limit_bytes": None}
    # v5e (16 MiB scoped-VMEM default) and anything unknown: conservative.
    return {"num_splits": 1, "max_row_tile": 2048, "vmem_limit_bytes": None}


def _slab_layout(n_elems, cfg):
    """Layout for a flattened-parameter slab: (row_tile, inner_steps, rows_padded)."""
    num_splits = cfg["num_splits"]
    rows_min = max(1, -(-n_elems // LANES))
    row_tile = min(cfg["max_row_tile"],
                   _round_up(-(-rows_min // num_splits), ROW_ALIGN))
    rows_padded = _round_up(rows_min, num_splits * row_tile)
    inner_steps = rows_padded // (num_splits * row_tile)
    return row_tile, inner_steps, rows_padded


def _flatten_and_pad(arrays, rows_padded, dtype=None):
    """Flatten arrays into one (rows_padded, LANES) slab.

    If ``dtype`` is None the slab keeps the arrays' native (promoted within
    the stream only) dtype; pass jnp.bfloat16 explicitly for prev/fisher to
    halve their HBM traffic.
    """
    if dtype is None:
        dtype = jnp.result_type(*[a.dtype for a in arrays])
    flat = jnp.concatenate([jnp.ravel(a).astype(dtype) for a in arrays])
    n = flat.shape[0]
    pad = rows_padded * LANES - n
    assert pad >= 0, "slab layout smaller than the flattened parameters"
    flat = jnp.pad(flat, (0, pad))
    return flat.reshape(rows_padded, LANES)


def _ewc_kernel(p_ref, prev_ref, fisher_ref, out_ref):
    # First inner step for this split: zero the resident (ACC_ROWS, 128)
    # accumulator block (the out_spec keeps it in VMEM across the inner axis).
    @pl.when(pl.program_id(1) == 0)
    def _():
        out_ref[...] = jnp.zeros_like(out_ref)

    # Elementwise tile work in f32 (slabs may be bf16 or f32).
    p = p_ref[...].astype(jnp.float32)
    q = prev_ref[...].astype(jnp.float32)
    f = fisher_ref[...].astype(jnp.float32)
    d = p - q
    contrib = f * d * d                                   # (row_tile, LANES)

    # Fold the row tile into ACC_ROWS sublane-aligned partial-sum rows:
    # 4 independent (8,128)-vreg accumulation chains (pure VPU adds, no
    # cross-lane XLU reduce, no single long dependent-add chain).
    partial = contrib.reshape(-1, ACC_ROWS, LANES).sum(axis=0)
    out_ref[...] += partial


def _ewc_partials(p_slab, prev_slab, fisher_slab, state):
    row_tile = state["row_tile"]
    inner_steps = state["inner_steps"]
    num_splits = state["num_splits"]
    grid = (num_splits, inner_steps)

    def in_map(c, i):
        return (c * inner_steps + i, 0)

    bytes_accessed = sum(int(a.size) * a.dtype.itemsize
                         for a in (p_slab, prev_slab, fisher_slab))
    bytes_accessed += num_splits * ACC_ROWS * LANES * 4
    cost = pl.CostEstimate(flops=4 * int(p_slab.size), transcendentals=0,
                           bytes_accessed=bytes_accessed)

    cp_kwargs = {
        # Leading axis can be sharded across TensorCores (v7x); trailing axis
        # is the sequential streaming reduction over row tiles.
        # TODO(synk): if an xprof profile on v7x shows one core idle, switch
        # this axis to pltpu.CORE_PARALLEL (or pl.core_map over a TC mesh).
        "dimension_semantics": ("parallel", "arbitrary"),
    }
    if state["vmem_limit_bytes"] is not None:
        cp_kwargs["vmem_limit_bytes"] = state["vmem_limit_bytes"]

    return pl.pallas_call(
        _ewc_kernel,
        out_shape=jax.ShapeDtypeStruct((num_splits * ACC_ROWS, LANES), jnp.float32),
        grid_spec=pltpu.PrefetchScalarGridSpec(
            num_scalar_prefetch=0,
            grid=grid,
            in_specs=[
                pl.BlockSpec((row_tile, LANES), in_map),
                pl.BlockSpec((row_tile, LANES), in_map),
                pl.BlockSpec((row_tile, LANES), in_map),
            ],
            out_specs=pl.BlockSpec((ACC_ROWS, LANES), lambda c, i: (c, 0)),
        ),
        compiler_params=pltpu.CompilerParams(**cp_kwargs),
        cost_estimate=cost,
    )(p_slab, prev_slab, fisher_slab)


def prepare_ewc_state(prev_params, fisher, *, prev_dtype=None, fisher_dtype=None):
    """Build the constant prev/fisher slabs once; reuse across training steps.

    Pass prev_dtype=fisher_dtype=jnp.bfloat16 to halve HBM traffic for the two
    constant streams (they are importance weights and tolerate bf16).
    """
    names = sorted(prev_params.keys())
    sizes = [int(prev_params[k].size) for k in names]
    n = int(sum(sizes))
    cfg = _chip_defaults()
    row_tile, inner_steps, rows_padded = _slab_layout(n, cfg)
    prev_slab = _flatten_and_pad([prev_params[k] for k in names], rows_padded,
                                 prev_dtype)
    fisher_slab = _flatten_and_pad([fisher[k] for k in names], rows_padded,
                                   fisher_dtype)
    return {
        "names": names,
        "sizes": sizes,
        "n_elems": n,
        "row_tile": row_tile,
        "inner_steps": inner_steps,
        "rows_padded": rows_padded,
        "num_splits": cfg["num_splits"],
        "vmem_limit_bytes": cfg["vmem_limit_bytes"],
        "prev_slab": prev_slab,
        "fisher_slab": fisher_slab,
    }


def flatten_params(params, state):
    """Build the current-params slab.

    Preferred usage: keep the live params stored as this slab in the training
    state (update it in place with the optimizer) so it is NOT rebuilt every
    step -- rebuilding adds a full extra read+write of the params stream.
    """
    names = state["names"]
    sizes = [int(params[k].size) for k in names]
    assert sizes == state["sizes"], (
        "params do not match the prepared EWC state (shape/size mismatch)")
    return _flatten_and_pad([params[k] for k in names], state["rows_padded"])


def ewc_loss_from_param_slab(p_slab, state, ewc_lambda=1.0):
    """Fast path: EWC loss given the current params already as a flat slab."""
    assert p_slab.shape == (state["rows_padded"], LANES), "bad param slab shape"
    partials = _ewc_partials(p_slab, state["prev_slab"], state["fisher_slab"],
                             state)
    # Tiny (num_splits*32, 128) final reduce + scale outside the kernel, so
    # ewc_lambda never forces a recompile.
    return 0.5 * jnp.float32(ewc_lambda) * jnp.sum(partials, dtype=jnp.float32)


def ewc_loss_with_state(params, state, ewc_lambda=1.0):
    """EWC loss given a params dict and the cached prev/fisher slabs.

    Note: this rebuilds the params slab every call (~5N instead of 3N HBM
    bytes); prefer keeping params as a slab and calling
    ewc_loss_from_param_slab in a training loop.
    """
    # TODO(synk): in a real training loop, alias the params slab in/out of the
    # optimizer update (input_output_aliases) instead of rebuilding it here.
    p_slab = flatten_params(params, state)
    return ewc_loss_from_param_slab(p_slab, state, ewc_lambda=ewc_lambda)


def ewc_loss(params, prev_params, fisher, ewc_lambda=1.0):
    """One-shot convenience wrapper (builds all slabs every call)."""
    state = prepare_ewc_state(prev_params, fisher)
    return ewc_loss_with_state(params, state, ewc_lambda=ewc_lambda)


def _reference(params, prev_params, fisher, ewc_lambda=1.0,
               prev_dtype=None, fisher_dtype=None):
    loss = jnp.float32(0.0)
    for n in params:
        prev = prev_params[n]
        fish = fisher[n]
        if prev_dtype is not None:
            prev = prev.astype(prev_dtype)
        if fisher_dtype is not None:
            fish = fish.astype(fisher_dtype)
        diff = params[n].astype(jnp.float32) - prev.astype(jnp.float32)
        loss = loss + jnp.sum(fish.astype(jnp.float32) * diff * diff)
    return 0.5 * ewc_lambda * loss


if __name__ == "__main__":
    key = jax.random.PRNGKey(0)

    # Deterministic synthetic "model" parameters (tiny conv net: conv weight
    # OIHW, conv bias, linear weight/bias).
    shapes = {
        "backbone.conv.weight": (4, 4, 3, 3),
        "backbone.conv.bias": (4,),
        "head.fc.weight": (8, 32),
        "head.fc.bias": (8,),
    }

    params, prev_params, fisher = {}, {}, {}
    for name, shp in shapes.items():
        key, k1, k2, k3 = jax.random.split(key, 4)
        p = jax.random.normal(k1, shp, dtype=jnp.float32)
        params[name] = p
        prev_params[name] = p + 0.1 * jax.random.normal(k2, shp, dtype=jnp.float32)
        # Fisher information is a non-negative importance estimate.
        fisher[name] = jax.random.uniform(k3, shp, dtype=jnp.float32)

    ewc_lambda = 2.0

    # TODO(synk): update_fisher (autograd Fisher estimation over a dataloader)
    # and print_log are host-side / framework concerns, not kernel work.

    # prev/fisher are constant between training steps -> build slabs once; the
    # current params are also kept as a slab so nothing is rebuilt per call.
    state = prepare_ewc_state(prev_params, fisher)
    p_slab = flatten_params(params, state)
    loss = ewc_loss_from_param_slab(p_slab, state, ewc_lambda=ewc_lambda)
    loss = jax.block_until_ready(loss)

    ref = _reference(params, prev_params, fisher, ewc_lambda=ewc_lambda)
    assert jnp.allclose(loss, ref, rtol=1e-5, atol=1e-5), (loss, ref)

    # Convenience dict-based path must agree too.
    loss2 = jax.block_until_ready(
        ewc_loss(params, prev_params, fisher, ewc_lambda=ewc_lambda))
    assert jnp.allclose(loss2, ref, rtol=1e-5, atol=1e-5), (loss2, ref)

    # bf16 prev/fisher slab path (halves HBM traffic for the constant streams);
    # compare against a reference that applies the same casts.
    state_bf16 = prepare_ewc_state(prev_params, fisher,
                                   prev_dtype=jnp.bfloat16,
                                   fisher_dtype=jnp.bfloat16)
    loss_bf16 = jax.block_until_ready(
        ewc_loss_from_param_slab(p_slab, state_bf16, ewc_lambda=ewc_lambda))
    ref_bf16 = _reference(params, prev_params, fisher, ewc_lambda=ewc_lambda,
                          prev_dtype=jnp.bfloat16, fisher_dtype=jnp.bfloat16)
    assert jnp.allclose(loss_bf16, ref_bf16, rtol=1e-4, atol=1e-4), (loss_bf16, ref_bf16)

    print("KERNEL_OK")
</pallas_src>

<mosaic_0001>
module attributes {stable_mosaic.version = 11 : i64} {
  func.func @_ewc_kernel(%arg0: i32, %arg1: i32, %arg2: memref<32x128xf32, #tpu.memory_space<vmem>>, %arg3: memref<32x128xf32, #tpu.memory_space<vmem>>, %arg4: memref<32x128xf32, #tpu.memory_space<vmem>>, %arg5: memref<32x128xf32, #tpu.memory_space<vmem>>) attributes {dimension_semantics = [#tpu.dimension_semantics<parallel>, #tpu.dimension_semantics<arbitrary>], iteration_bounds = array<i64: 1, 1>, scalar_prefetch = 0 : i64, scratch_operands = 0 : i64, tpu.core_type = #tpu.core_type<tc>, window_params = [{transform_indices = @transform_0, window_bounds = array<i64: 32, 128>}, {transform_indices = @transform_1, window_bounds = array<i64: 32, 128>}, {transform_indices = @transform_2, window_bounds = array<i64: 32, 128>}, {transform_indices = @transform_3, window_bounds = array<i64: 32, 128>}]} {
    %c0_i32 = arith.constant 0 : i32
    %0 = arith.cmpi eq, %arg1, %c0_i32 : i32
    %1 = arith.extui %0 : i1 to i32
    %c0_i32_0 = arith.constant 0 : i32
    %2 = arith.cmpi ne, %1, %c0_i32_0 : i32
    scf.if %2 {
      %cst_10 = arith.constant 0.000000e+00 : f32
      %14 = vector.broadcast %cst_10 : f32 to vector<32x128xf32>
      %c0_11 = arith.constant 0 : index
      %c0_12 = arith.constant 0 : index
      %15 = vector.load %arg5[%c0_11, %c0_12] : memref<32x128xf32, #tpu.memory_space<vmem>>, vector<32x128xf32>
      tpu.vector_store %arg5[%c0_11, %c0_12], %14 {strides = array<i32>} : memref<32x128xf32, #tpu.memory_space<vmem>>, vector<32x128xf32>,
    } else {
    }
    %c0 = arith.constant 0 : index
    %c0_1 = arith.constant 0 : index
    %3 = vector.load %arg2[%c0, %c0_1] : memref<32x128xf32, #tpu.memory_space<vmem>>, vector<32x128xf32>
    %c0_2 = arith.constant 0 : index
    %c0_3 = arith.constant 0 : index
    %4 = vector.load %arg3[%c0_2, %c0_3] : memref<32x128xf32, #tpu.memory_space<vmem>>, vector<32x128xf32>
    %c0_4 = arith.constant 0 : index
    %c0_5 = arith.constant 0 : index
    %5 = vector.load %arg4[%c0_4, %c0_5] : memref<32x128xf32, #tpu.memory_space<vmem>>, vector<32x128xf32>
    %6 = arith.subf %3, %4 : vector<32x128xf32>
    %7 = arith.mulf %5, %6 : vector<32x128xf32>
    %8 = arith.mulf %7, %6 : vector<32x128xf32>
    %9 = vector.shape_cast %8 : vector<32x128xf32> to vector<1x32x128xf32>
    %cst = arith.constant dense<0.000000e+00> : vector<32x128xf32>
    %10 = vector.multi_reduction <add>, %9, %cst [0] : vector<1x32x128xf32> to vector<32x128xf32>
    %c0_6 = arith.constant 0 : index
    %c0_7 = arith.constant 0 : index
    %11 = vector.load %arg5[%c0_6, %c0_7] : memref<32x128xf32, #tpu.memory_space<vmem>>, vector<32x128xf32>
    %12 = arith.addf %11, %10 : vector<32x128xf32>
    %c0_8 = arith.constant 0 : index
    %c0_9 = arith.constant 0 : index
    %13 = vector.load %arg5[%c0_8, %c0_9] : memref<32x128xf32, #tpu.memory_space<vmem>>, vector<32x128xf32>
    tpu.vector_store %arg5[%c0_8, %c0_9], %12 {strides = array<i32>} : memref<32x128xf32, #tpu.memory_space<vmem>>, vector<32x128xf32>,
    return
  }
  func.func @transform_0(%arg0: i32, %arg1: i32) -> (i32, i32) {
    %c1_i32 = arith.constant 1 : i32
    %0 = arith.muli %arg0, %c1_i32 : i32
    %1 = arith.addi %0, %arg1 : i32
    %c0_i32 = arith.constant 0 : i32
    %c0_i32_0 = arith.constant 0 : i32
    return %1, %c0_i32 : i32, i32
  }
  func.func @transform_1(%arg0: i32, %arg1: i32) -> (i32, i32) {
    %c1_i32 = arith.constant 1 : i32
    %0 = arith.muli %arg0, %c1_i32 : i32
    %1 = arith.addi %0, %arg1 : i32
    %c0_i32 = arith.constant 0 : i32
    %c0_i32_0 = arith.constant 0 : i32
    return %1, %c0_i32 : i32, i32
  }
  func.func @transform_2(%arg0: i32, %arg1: i32) -> (i32, i32) {
    %c1_i32 = arith.constant 1 : i32
    %0 = arith.muli %arg0, %c1_i32 : i32
    %1 = arith.addi %0, %arg1 : i32
    %c0_i32 = arith.constant 0 : i32
    %c0_i32_0 = arith.constant 0 : i32
    return %1, %c0_i32 : i32, i32
  }
  func.func @transform_3(%arg0: i32, %arg1: i32) -> (i32, i32) {
    %c0_i32 = arith.constant 0 : i32
    %c0_i32_0 = arith.constant 0 : i32
    return %arg0, %c0_i32 : i32, i32
  }
}

</mosaic_0001>

<bundles_post_ra>
// kernel: tpu_custom_call.1
= control target key start
LH: loop header
LB: loop body
LE: loop exit
PB: predicated region body
PF: predicated region fallthrough
CT: control target
= control target key end

     0   :  { %8 = vsyncpa [#allocation3], 0  ;;  %s334_s0 = inlined_call_operand.hbm [shape: f32[32,128], index: 0, kind: input, shape index: {}]   ;;  %s335_s1 = inlined_call_operand.hbm [shape: f32[32,128], index: 1, kind: input, shape index: {}]   ;;  %s336_s2 = inlined_call_operand.hbm [shape: f32[32,128], index: 2, kind: input, shape index: {}]   ;;  %s337_s3 = inlined_call_operand.hbm [shape: f32[32,128], index: 3, kind: output, shape index: {}]  }
   0x1   :  { %9 = vsyncpa [#allocation6], 0 }
   0x2   :  { %10 = vsyncpa [#allocation4], 0  ;;  %s241_s12 = smov [#allocation5]   ;;  %s242_s14 = smov [#allocation2]  }
   0x3   :  { %s36_s13 = sshll.u32 %s241_s12, 4  ;;  %s20_s15 = sshll.u32 %s242_s14, 4  ;;  %s37_s13 = int_to_ptr.vmem [resolvable:$true] %s36_s13  ;;  %s267_s15 = int_to_ptr.vmem [resolvable:$true] %s20_s15 }
   0x4   :  { %s147_s18 = scalar_lea.hbm %s335_s1, 512 }
   0x5   :  { %p148_p0 = scmp.ne.s32.totalorder %s335_s1, %s147_s18  ;;  %p151_p1 = scmp.lt.u32.totalorder %s147_s18, %s335_s1 }
   0x7   :  { %p153_p2 = pnand %p151_p1, %p148_p0 }
   0x9   :  { %156 = shalt.err (!%p153_p2)
}
   0xa   :  { %s157_s23 = scalar_lea.vmem %s37_s13, 512  ;;  %p162_p4 = scmp.lt.s32.totalorder %s37_s13, %s37_s13 }
   0xb   :  { %p158_p3 = scmp.ne.s32.totalorder %s37_s13, %s157_s23  ;;  %p163_p5 = scmp.lt.s32.totalorder %s157_s23, %s157_s23 }
   0xd   :  { %p164_p6 = por %p163_p5, %p162_p4 }
   0xf   :  { %p165_p7 = pnand %p164_p6, %p158_p3 }
  0x11   :  { %168 = shalt.err (!%p165_p7)
}
  0x12   :  { %s243_s24 = smov 128   ;;  %s244_s25 = smov 8  }
  0x13   :  { %42 = dma.hbm_to_vmem [thread:$0]  %s335_s1, 512, %s37_s13, [#allocation6], %s243_s24, %s243_s24, %s244_s25  }
  0x14   :  { %s169_s30 = scalar_lea.hbm %s334_s0, 512 }
  0x15   :  { %p170_p8 = scmp.ne.s32.totalorder %s334_s0, %s169_s30  ;;  %p173_p9 = scmp.lt.u32.totalorder %s169_s30, %s334_s0 }
  0x17   :  { %p175_p10 = pnand %p173_p9, %p170_p8 }
  0x19   :  { %178 = shalt.err (!%p175_p10)
}
  0x1a   :  { %s179_s8 = scalar_lea.vmem %s267_s15, 512  ;;  %p184_p12 = scmp.lt.s32.totalorder %s267_s15, %s267_s15 }
  0x1b   :  { %p180_p11 = scmp.ne.s32.totalorder %s267_s15, %s179_s8  ;;  %p185_p13 = scmp.lt.s32.totalorder %s179_s8, %s179_s8 }
  0x1d   :  { %p186_p0 = por %p185_p13, %p184_p12 }
  0x1f   :  { %p187_p1 = pnand %p186_p0, %p180_p11 }
  0x21   :  { %190 = shalt.err (!%p187_p1)
}
  0x22   :  { %26 = dma.hbm_to_vmem [thread:$0]  %s334_s0, 512, %s267_s15, [#allocation3], %s243_s24, %s243_s24, %s244_s25  }
  0x23   :  { %s245_s10 = smov [#allocation7]   ;;  %s191_s14 = scalar_lea.hbm %s336_s2, 512 }
  0x24   :  { %s52_s11 = sshll.u32 %s245_s10, 4  ;;  %p192_p2 = scmp.ne.s32.totalorder %s336_s2, %s191_s14  ;;  %s53_s11 = int_to_ptr.vmem [resolvable:$true] %s52_s11 }
  0x25   :  { %p195_p3 = scmp.lt.u32.totalorder %s191_s14, %s336_s2 }
  0x27   :  { %p197_p4 = pnand %p195_p3, %p192_p2 }
  0x29   :  { %200 = shalt.err (!%p197_p4)
}
  0x2a   :  { %s201_s20 = scalar_lea.vmem %s53_s11, 512  ;;  %p206_p6 = scmp.lt.s32.totalorder %s53_s11, %s53_s11 }
  0x2b   :  { %p202_p5 = scmp.ne.s32.totalorder %s53_s11, %s201_s20  ;;  %p207_p7 = scmp.lt.s32.totalorder %s201_s20, %s201_s20 }
  0x2d   :  { %p208_p8 = por %p207_p7, %p206_p6 }
  0x2f   :  { %p209_p9 = pnand %p208_p8, %p202_p5 }
  0x31   :  { %212 = shalt.err (!%p209_p9)
}
  0x32   :  { %58 = dma.hbm_to_vmem [thread:$0]  %s336_s2, 512, %s53_s11, [#allocation6], %s243_s24, %s243_s24, %s244_s25  }
  0x33   :  { %235 = dma.done.wait [#allocation3], 512  }
  0x34   :  { %236 = vsyncadd [#allocation3], 4294966784 }
  0x35   :  { %237 = dma.done.wait [#allocation6], 1024  }
  0x36   :  { %238 = vsyncadd [#allocation6], 4294966272  ;;  %v82_v0 = vld [vmem:[#allocation2] sm:$0xff]  ;;  %v83_v4 = vld [vmem:[#allocation2 + $0x8] sm:$0xff]  ;;  %s246_s2 = smov [#allocation8]  }
  0x37   :  { %v86_v1 = vld [vmem:[#allocation5] sm:$0xff]  ;;  %v87_v5 = vld [vmem:[#allocation5 + $0x8] sm:$0xff]  ;;  %v84_v8 = vld [vmem:[#allocation2 + $0x10] sm:$0xff]  ;;  %s127_s21 = sshll.u32 %s246_s2, 4  ;;  %s128_s21 = int_to_ptr.vmem [resolvable:$true] %s127_s21 }
  0x38   :  { %v90_v2 = vld [vmem:[#allocation7] sm:$0xff]  ;;  %v94_v3 = vsub.f32 %v82_v0, %v86_v1  ;;  %v91_v6 = vld [vmem:[#allocation7 + $0x8] sm:$0xff]  ;;  %v95_v7 = vsub.f32 %v83_v4, %v87_v5  ;;  %v88_v9 = vld [vmem:[#allocation5 + $0x10] sm:$0xff]  ;;  %s213_s22 = scalar_lea.vmem %s128_s21, 512  ;;  %p218_p11 = scmp.lt.s32.totalorder %s128_s21, %s128_s21 }
  0x39   :  { %v92_v10 = vld [vmem:[#allocation7 + $0x10] sm:$0xff]  ;;  %v96_v12 = vsub.f32 %v84_v8, %v88_v9  ;;  %v85_v13 = vld [vmem:[#allocation2 + $0x18] sm:$0xff]  ;;  %p214_p10 = scmp.ne.s32.totalorder %s128_s21, %s213_s22  ;;  %p219_p12 = scmp.lt.s32.totalorder %s213_s22, %s213_s22 }
  0x3a   :  { %v98_v11 = vmul.f32 %v94_v3, %v90_v2  ;;  %v89_v14 = vld [vmem:[#allocation5 + $0x18] sm:$0xff]  ;;  %v99_v16 = vmul.f32 %v95_v7, %v91_v6 }
  0x3b   :  { %v93_v15 = vld [vmem:[#allocation7 + $0x18] sm:$0xff]  ;;  %v97_v17 = vsub.f32 %v85_v13, %v89_v14  ;;  %v100_v19 = vmul.f32 %v96_v12, %v92_v10  ;;  %p220_p13 = por %p219_p12, %p218_p11 }
  0x3c   :  { %v102_v18 = vmul.f32 %v98_v11, %v94_v3  ;;  %v103_v20 = vmul.f32 %v99_v16, %v95_v7 }
  0x3d   :  { %v101_v21 = vmul.f32 %v97_v17, %v93_v15  ;;  %v104_v22 = vmul.f32 %v100_v19, %v96_v12  ;;  %p221_p0 = pnand %p220_p13, %p214_p10 }
  0x3e   :  { %118 = vst [vmem:[#allocation8] sm:$0xff] %v102_v18  ;;  %119 = vst [vmem:[#allocation8 + $0x8] sm:$0xff] %v103_v20 }
  0x3f   :  { %v105_v23 = vmul.f32 %v101_v21, %v97_v17  ;;  %120 = vst [vmem:[#allocation8 + $0x10] sm:$0xff] %v104_v22 }
  0x41   :  { %121 = vst [vmem:[#allocation8 + $0x18] sm:$0xff] %v105_v23 }
  0x42   :  { %224 = shalt.err (!%p221_p0)
}
  0x43   :  { %s225_s27 = scalar_lea.hbm %s337_s3, 512 }
  0x44   :  { %p226_p1 = scmp.ne.s32.totalorder %s337_s3, %s225_s27  ;;  %p229_p2 = scmp.lt.u32.totalorder %s225_s27, %s337_s3 }
  0x46   :  { %p231_p3 = pnand %p229_p2, %p226_p1 }
  0x48   :  { %234 = shalt.err (!%p231_p3)
}
  0x49   :  { %133 = dma.vmem_to_hbm [thread:$0]  %s128_s21, 512, %s337_s3, [#allocation4], %s243_s24, %s243_s24, %s244_s25  }
  0x4a   :  { %239 = dma.done.wait [#allocation4], 512  }
  0x4b   :  { %240 = vsyncadd [#allocation4], 4294966784 }
  0x4c   :  { %137 = vsyncpa [#allocation3], 1 }
  0x4d   :  { %138 = vsyncpa [#allocation6], 1 }
  0x4e   :  { %139 = vsyncpa [#allocation4], 1 }

</bundles_post_ra>
